<compile_context>
chip_gen: v6e
topology: v6e:2x2x1
jax: 0.10.0
libtpu: 0.0.40
codegen_flags: <defaults>
</compile_context>

<pallas_src>
import functools

import jax
import jax.numpy as jnp
from jax.experimental import pallas as pl
from jax.experimental.pallas import tpu as pltpu


# ----------------------------- Pallas kernel --------------------------------
def _conv_gemm_bias_relu_kernel(cols_ref, w_ref, b_ref, o_ref):
    """Fused conv-as-GEMM + bias + ReLU, single grid step.

    cols_ref: (B, K*K*Cin, S_pad)  f32 im2col slab, S_pad = round_up(H*W, 128)
    w_ref:    (Cout, K*K*Cin)      f32 folded weight matrix
    b_ref:    (Cout, 1)            f32 bias column
    o_ref:    (B, Cout, S_pad)     f32 output (already NCHW-ordered per image)
    """
    w = w_ref[...]
    b = b_ref[...]
    # Static, tiny batch loop: one MXU push per image, lane-dense (S_pad) stores.
    for bi in range(o_ref.shape[0]):
        acc = jnp.dot(w, cols_ref[bi], preferred_element_type=jnp.float32)
        o_ref[bi] = jnp.maximum(acc + b, 0.0).astype(o_ref.dtype)


@functools.partial(jax.jit, static_argnames=("K", "pad"))
def conv_relu_pallas(x, w2d, b_col, *, K=3, pad=1):
    """Equivalent of nn.Conv2d(Cin, Cout, K, stride=1, padding=pad) + ReLU.

    x:     (B, Cin, H, W) f32 NCHW
    w2d:   (Cout, Cin*K*K) f32  -- weight.reshape(Cout, -1), precomputed in __init__
    b_col: (Cout, 1) f32        -- bias column, precomputed in __init__
    Returns (B, Cout, H, W) float32 (NCHW; no output transpose needed).
    """
    B, Cin, H, W = x.shape
    Cout, KKCin = w2d.shape
    S = H * W
    S_pad = ((S + 127) // 128) * 128          # lane-dense output / slab width

    # --- cheap XLA-side prep: im2col slab, row order (cin, kh, kw) matches
    #     weight.reshape(Cout, Cin*K*K).  One pad + one stack/reshape fusion. ---
    xp = jnp.pad(x, ((0, 0), (0, 0), (pad, pad), (pad, pad)))
    taps = [xp[:, :, kh:kh + H, kw:kw + W] for kh in range(K) for kw in range(K)]
    cols = jnp.stack(taps, axis=2).reshape(B, KKCin, S)        # (B, Cin*K*K, H*W)
    if S_pad != S:
        cols = jnp.pad(cols, ((0, 0), (0, 0), (0, S_pad - S)))

    flops = 2 * B * Cout * KKCin * S
    bytes_accessed = (cols.size + w2d.size + b_col.size + B * Cout * S_pad) * 4

    out = pl.pallas_call(
        _conv_gemm_bias_relu_kernel,
        out_shape=jax.ShapeDtypeStruct((B, Cout, S_pad), jnp.float32),
        grid_spec=pltpu.PrefetchScalarGridSpec(
            num_scalar_prefetch=0,
            grid=(1,),                                   # single step: no pipeline bubbles
            in_specs=[
                pl.BlockSpec((B, KKCin, S_pad), lambda i: (0, 0, 0)),  # im2col slab
                pl.BlockSpec((Cout, KKCin), lambda i: (0, 0)),         # folded weights
                pl.BlockSpec((Cout, 1), lambda i: (0, 0)),             # bias column
            ],
            out_specs=pl.BlockSpec((B, Cout, S_pad), lambda i: (0, 0, 0)),
        ),
        compiler_params=pltpu.CompilerParams(
            dimension_semantics=("arbitrary",),
            vmem_limit_bytes=8 * 1024 * 1024,            # whole problem is ~200 KB of VMEM
        ),
        cost_estimate=pl.CostEstimate(
            flops=flops, transcendentals=0, bytes_accessed=bytes_accessed),
    )(cols, w2d, b_col)

    if S_pad != S:
        out = out[:, :, :S]
    return out.reshape(B, Cout, H, W)


# ------------------------ BaseModel-equivalent wrapper -----------------------
class SyntheticInnerModule:
    """Deterministic stand-in for the wrapped nn.Module: Conv2d(4->8,3,pad=1)+ReLU."""

    def __init__(self, key, cin=4, cout=8, k=3):
        kw, kb = jax.random.split(key)
        fan_in = cin * k * k
        bound = 1.0 / (fan_in ** 0.5)
        self.weight = jax.random.uniform(kw, (cout, cin, k, k), jnp.float32,
                                         minval=-bound, maxval=bound)
        self.bias = jax.random.uniform(kb, (cout,), jnp.float32,
                                       minval=-bound, maxval=bound)
        self.k = k
        # Hoisted, call-invariant kernel operands (perf-review item #3):
        self.w2d = self.weight.reshape(cout, cin * k * k)   # (Cout, K*K*Cin) f32
        self.b_col = self.bias.reshape(cout, 1)              # (Cout, 1) f32

    def __call__(self, x):
        return conv_relu_pallas(x, self.w2d, self.b_col, K=self.k, pad=self.k // 2)


class BaseModel:
    """Pass-through wrapper mirroring CIA/modeling/BaseModel.py::BaseModel.forward."""
    # TODO(synk): save_pretrained / from_pretrained are checkpoint I/O (torch.save /
    # torch.load / HF hub download) -- host-side, no Pallas equivalent, omitted.

    def __init__(self, opt, module):
        self.opt = opt
        self.model = module

    def __call__(self, *inputs, **kwargs):
        outputs = self.model(*inputs, **kwargs)
        return outputs


# ---------------------------------- main -------------------------------------
if __name__ == "__main__":
    key = jax.random.PRNGKey(0)
    k_x, k_m = jax.random.split(key)

    B, C, H, W = 2, 4, 16, 16
    x = jax.random.normal(k_x, (B, C, H, W), dtype=jnp.float32)

    model = BaseModel(opt={"device": "tpu"},
                      module=SyntheticInnerModule(k_m, cin=C, cout=8, k=3))
    y = jax.block_until_ready(model(x))

    # Full-precision XLA reference; remaining kernel error is only the MXU's
    # internal matmul rounding (f32 activations/weights end-to-end).
    ref = jax.lax.conv_general_dilated(
        x, model.model.weight, window_strides=(1, 1), padding="SAME",
        dimension_numbers=("NCHW", "OIHW", "NCHW"),
        precision=jax.lax.Precision.HIGHEST)
    ref = jnp.maximum(ref + model.model.bias.reshape(1, -1, 1, 1), 0.0)

    assert y.shape == (B, 8, H, W)
    max_err = float(jnp.max(jnp.abs(y - ref)))
    assert jnp.allclose(y, ref, atol=1e-2, rtol=1e-2), f"max_err={max_err}"

    print("KERNEL_OK")
</pallas_src>

<mosaic_0001>
module attributes {stable_mosaic.version = 11 : i64} {
  func.func @_conv_gemm_bias_relu_kernel(%arg0: i32, %arg1: memref<2x36x256xf32, #tpu.memory_space<vmem>>, %arg2: memref<8x36xf32, #tpu.memory_space<vmem>>, %arg3: memref<8x1xf32, #tpu.memory_space<vmem>>, %arg4: memref<2x8x256xf32, #tpu.memory_space<vmem>>) attributes {dimension_semantics = [#tpu.dimension_semantics<arbitrary>], iteration_bounds = array<i64: 1>, scalar_prefetch = 0 : i64, scratch_operands = 0 : i64, tpu.core_type = #tpu.core_type<tc>, window_params = [{pipeline_mode = #tpu.pipeline_mode<synchronous>, transform_indices = @transform_0, window_bounds = array<i64: 2, 36, 256>}, {pipeline_mode = #tpu.pipeline_mode<synchronous>, transform_indices = @transform_1, window_bounds = array<i64: 8, 36>}, {pipeline_mode = #tpu.pipeline_mode<synchronous>, transform_indices = @transform_2, window_bounds = array<i64: 8, 1>}, {pipeline_mode = #tpu.pipeline_mode<synchronous>, transform_indices = @transform_3, window_bounds = array<i64: 2, 8, 256>}]} {
    %c0 = arith.constant 0 : index
    %c0_0 = arith.constant 0 : index
    %0 = vector.load %arg2[%c0, %c0_0] : memref<8x36xf32, #tpu.memory_space<vmem>>, vector<8x36xf32>
    %c0_1 = arith.constant 0 : index
    %c0_2 = arith.constant 0 : index
    %1 = vector.load %arg3[%c0_1, %c0_2] : memref<8x1xf32, #tpu.memory_space<vmem>>, vector<8x1xf32>
    %c0_3 = arith.constant 0 : index
    %c0_4 = arith.constant 0 : index
    %c0_5 = arith.constant 0 : index
    %2 = vector.load %arg1[%c0_3, %c0_4, %c0_5] : memref<2x36x256xf32, #tpu.memory_space<vmem>>, vector<1x36x256xf32>
    %3 = vector.shape_cast %2 : vector<1x36x256xf32> to vector<36x256xf32>
    %cst = arith.constant dense<0.000000e+00> : vector<8x256xf32>
    %4 = tpu.matmul %0, %3, %cst {dimension_numbers = #tpu.dot_dimension_numbers<[1], [0], [0], [1], [0, 0, 1, 1], [], []>} : vector<8x36xf32>, vector<36x256xf32>, vector<8x256xf32> -> vector<8x256xf32>
    %5 = vector.broadcast %1 : vector<8x1xf32> to vector<8x256xf32>
    %6 = arith.addf %4, %5 : vector<8x256xf32>
    %cst_6 = arith.constant 0.000000e+00 : f32
    %7 = vector.broadcast %cst_6 : f32 to vector<8x256xf32>
    %8 = arith.maximumf %6, %7 : vector<8x256xf32>
    %c0_7 = arith.constant 0 : index
    %c0_8 = arith.constant 0 : index
    %c0_9 = arith.constant 0 : index
    %9 = vector.load %arg4[%c0_7, %c0_8, %c0_9] : memref<2x8x256xf32, #tpu.memory_space<vmem>>, vector<1x8x256xf32>
    %10 = vector.shape_cast %9 : vector<1x8x256xf32> to vector<8x256xf32>
    %11 = vector.shape_cast %8 : vector<8x256xf32> to vector<1x8x256xf32>
    tpu.vector_store %arg4[%c0_7, %c0_8, %c0_9], %11 {strides = array<i32>} : memref<2x8x256xf32, #tpu.memory_space<vmem>>, vector<1x8x256xf32>,
    %c1 = arith.constant 1 : index
    %c0_10 = arith.constant 0 : index
    %c0_11 = arith.constant 0 : index
    %12 = vector.load %arg1[%c1, %c0_10, %c0_11] : memref<2x36x256xf32, #tpu.memory_space<vmem>>, vector<1x36x256xf32>
    %13 = vector.shape_cast %12 : vector<1x36x256xf32> to vector<36x256xf32>
    %cst_12 = arith.constant dense<0.000000e+00> : vector<8x256xf32>
    %14 = tpu.matmul %0, %13, %cst_12 {dimension_numbers = #tpu.dot_dimension_numbers<[1], [0], [0], [1], [0, 0, 1, 1], [], []>} : vector<8x36xf32>, vector<36x256xf32>, vector<8x256xf32> -> vector<8x256xf32>
    %15 = vector.broadcast %1 : vector<8x1xf32> to vector<8x256xf32>
    %16 = arith.addf %14, %15 : vector<8x256xf32>
    %cst_13 = arith.constant 0.000000e+00 : f32
    %17 = vector.broadcast %cst_13 : f32 to vector<8x256xf32>
    %18 = arith.maximumf %16, %17 : vector<8x256xf32>
    %c1_14 = arith.constant 1 : index
    %c0_15 = arith.constant 0 : index
    %c0_16 = arith.constant 0 : index
    %19 = vector.load %arg4[%c1_14, %c0_15, %c0_16] : memref<2x8x256xf32, #tpu.memory_space<vmem>>, vector<1x8x256xf32>
    %20 = vector.shape_cast %19 : vector<1x8x256xf32> to vector<8x256xf32>
    %21 = vector.shape_cast %18 : vector<8x256xf32> to vector<1x8x256xf32>
    tpu.vector_store %arg4[%c1_14, %c0_15, %c0_16], %21 {strides = array<i32>} : memref<2x8x256xf32, #tpu.memory_space<vmem>>, vector<1x8x256xf32>,
    return
  }
  func.func @transform_0(%arg0: i32) -> (i32, i32, i32) {
    %c0_i32 = arith.constant 0 : i32
    %c0_i32_0 = arith.constant 0 : i32
    %c0_i32_1 = arith.constant 0 : i32
    %c0_i32_2 = arith.constant 0 : i32
    return %c0_i32, %c0_i32_0, %c0_i32_1 : i32, i32, i32
  }
  func.func @transform_1(%arg0: i32) -> (i32, i32) {
    %c0_i32 = arith.constant 0 : i32
    %c0_i32_0 = arith.constant 0 : i32
    %c0_i32_1 = arith.constant 0 : i32
    return %c0_i32, %c0_i32_0 : i32, i32
  }
  func.func @transform_2(%arg0: i32) -> (i32, i32) {
    %c0_i32 = arith.constant 0 : i32
    %c0_i32_0 = arith.constant 0 : i32
    %c0_i32_1 = arith.constant 0 : i32
    return %c0_i32, %c0_i32_0 : i32, i32
  }
  func.func @transform_3(%arg0: i32) -> (i32, i32, i32) {
    %c0_i32 = arith.constant 0 : i32
    %c0_i32_0 = arith.constant 0 : i32
    %c0_i32_1 = arith.constant 0 : i32
    %c0_i32_2 = arith.constant 0 : i32
    return %c0_i32, %c0_i32_0, %c0_i32_1 : i32, i32, i32
  }
}

</mosaic_0001>

<bundles_post_ra>
// kernel: conv_relu_pallas.1
= control target key start
LH: loop header
LB: loop body
LE: loop exit
PB: predicated region body
PF: predicated region fallthrough
CT: control target
= control target key end

     0   :  { %vm35_vm0 = vcmask 1043456   ;;  %v235_v3 = vmov 0.0   ;;  %vm31_vm1 = vcmask 293888   ;;  %v236_v23 = vmov 0   ;;  %s335_s0 = inlined_call_operand.vmem [shape: f32[2,36,256], index: 0, kind: input, shape index: {}]   ;;  %s336_s1 = inlined_call_operand.vmem [shape: f32[8,36], index: 1, kind: input, shape index: {}]   ;;  %s337_s2 = inlined_call_operand.vmem [shape: f32[8,1], index: 2, kind: input, shape index: {}]   ;;  %s338_s3 = inlined_call_operand.vmem [shape: f32[2,8,256], index: 3, kind: output, shape index: {}]  }
   0x1   :  { %v25_v0 = vld [vmem:[%s335_s0 + $0x48] sm:$0xf]  ;;  %v226_v1 = vld [vmem:[%s335_s0 + $0x98] sm:$0xf]  ;;  %v24_v2 = vld [vmem:[%s335_s0 + $0x40] sm:$0xf]  ;;  %106 = vmatprep.mubr.f32.mxu0 %v235_v3  ;;  %198 = vmatprep.mubr.f32.mxu1 %v235_v3 }
   0x2   :  { %214 = vmatprep.subr.msk.mxu0 %vm35_vm0, %v25_v0  ;;  %227 = vmatprep.subr.msk.mxu1 %vm35_vm0, %v226_v1  ;;  %v225_v4 = vld [vmem:[%s335_s0 + $0x90] sm:$0xf]  ;;  %v23_v5 = vld [vmem:[%s335_s0 + $0x38] sm:$0xff]  ;;  %v224_v6 = vld [vmem:[%s335_s0 + $0x88] sm:$0xff] }
   0x3   :  { %215 = vmatpush1.msk.msra.mxu0 %vm35_vm0, %v24_v2  ;;  %228 = vmatpush1.msk.msra.mxu1 %vm35_vm0, %v225_v4  ;;  %v22_v7 = vld [vmem:[%s335_s0 + $0x30] sm:$0xff]  ;;  %v223_v8 = vld [vmem:[%s335_s0 + $0x80] sm:$0xff]  ;;  %v21_v9 = vld [vmem:[%s335_s0 + $0x28] sm:$0xff] }
   0x4   :  { %66 = vmatprep.subr.mxu0 %v23_v5  ;;  %158 = vmatprep.subr.mxu1 %v224_v6  ;;  %v222_v10 = vld [vmem:[%s335_s0 + $0x78] sm:$0xff]  ;;  %v20_v11 = vld [vmem:[%s335_s0 + $0x20] sm:$0xff]  ;;  %v221_v12 = vld [vmem:[%s335_s0 + $0x70] sm:$0xff] }
   0x5   :  { %67 = vmatpush1.msra.mxu0 %v22_v7  ;;  %159 = vmatpush1.msra.mxu1 %v223_v8  ;;  %v19_v13 = vld [vmem:[%s335_s0 + $0x18] sm:$0xff]  ;;  %v220_v14 = vld [vmem:[%s335_s0 + $0x68] sm:$0xff]  ;;  %v18_v15 = vld [vmem:[%s335_s0 + $0x10] sm:$0xff] }
   0x6   :  { %68 = vmatprep.subr.mxu0 %v21_v9  ;;  %160 = vmatprep.subr.mxu1 %v222_v10  ;;  %v219_v16 = vld [vmem:[%s335_s0 + $0x60] sm:$0xff]  ;;  %v17_v17 = vld [vmem:[%s335_s0 + $0x8] sm:$0xff]  ;;  %v218_v18 = vld [vmem:[%s335_s0 + $0x58] sm:$0xff] }
   0x7   :  { %69 = vmatpush1.msra.mxu0 %v20_v11  ;;  %161 = vmatpush1.msra.mxu1 %v221_v12  ;;  %v16_v19 = vld [vmem:[%s335_s0] sm:$0xff]  ;;  %v217_v20 = vld [vmem:[%s335_s0 + $0x50] sm:$0xff] }
   0x8   :  { %70 = vmatprep.subr.mxu0 %v19_v13  ;;  %162 = vmatprep.subr.mxu1 %v220_v14  ;;  %v14_v21 = vld [vmem:[%s336_s1] sm:$0xff] }
   0x9   :  { %71 = vmatpush1.msra.mxu0 %v18_v15  ;;  %163 = vmatpush1.msra.mxu1 %v219_v16  ;;  %v15_v22 = vld [vmem:[%s337_s2] sm:$0xff] }
   0xa   :  { %72 = vmatprep.subr.mxu0 %v17_v17  ;;  %164 = vmatprep.subr.mxu1 %v218_v18 }
   0xb   :  { %73 = vmatpush1.msra.mxu0 %v16_v19  ;;  %165 = vmatpush1.msra.mxu1 %v217_v20 }
   0xc   :  { %216 = vmatmul.mubr.msk.f32.vlgmr.msra.gmra.mxu0 %vm31_vm1, %v14_v21  ;;  %229 = vmatmul.mubr.msk.f32.vlgmr.msra.gmra.mxu1 %vm31_vm1, %v14_v21 }
   0xd   :  { %234 = vset.pattern.permute.xlu0 %v236_v23 }
   0xe   :  { %28 = vperm.xlu0 %234, %v15_v22  }
  0x89   :  { %v29_v24 = vpop.permute.xlu0 %28 }
  0xcc   :  { %v108_v25 = vpop.f32.mrf.mxu0  ;;  %v200_v26 = vpop.f32.mrf.mxu1 }
  0xcd   :  { %v109_v27 = vadd.f32 %v108_v25, %v29_v24  ;;  %v201_v28 = vadd.f32 %v200_v26, %v29_v24 }
  0xce   :  { %v110_v29 = vpop.f32.mrf.mxu0  ;;  %v202_v30 = vpop.f32.mrf.mxu1 }
  0xcf   :  { %v113_v31 = vmax.f32 %v109_v27, 0.0  ;;  %v205_v32 = vmax.f32 %v201_v28, 0.0  ;;  %v111_v33 = vadd.f32 %v110_v29, %v29_v24  ;;  %v203_v34 = vadd.f32 %v202_v30, %v29_v24 }
  0xd1   :  { %115 = vst [vmem:[%s338_s3] sm:$0xff] %v113_v31  ;;  %230 = vst [vmem:[%s338_s3 + $0x10] sm:$0xff] %v205_v32  ;;  %v114_v35 = vmax.f32 %v111_v33, 0.0  ;;  %v206_v36 = vmax.f32 %v203_v34, 0.0 }
  0xd3   :  { %116 = vst [vmem:[%s338_s3 + $0x8] sm:$0xff] %v114_v35  ;;  %231 = vst [vmem:[%s338_s3 + $0x18] sm:$0xff] %v206_v36 }

</bundles_post_ra>
